<compile_context>
chip_gen: v5e
topology: v5e:2x2
jax: 0.10.0
libtpu: 0.0.40
codegen_flags: <defaults>
</compile_context>

<pallas_src>
import functools
import math

import jax
import jax.numpy as jnp
from jax.experimental import pallas as pl
from jax.experimental.pallas import tpu as pltpu


# ---------------------------------------------------------------------------
# Tile selection helpers (no host-side padding: full-extent blocks when small,
# ragged edge blocks otherwise).
# ---------------------------------------------------------------------------
def _tile_m(m):
    return 256 if m > 256 else m


def _tile_n(n):
    if n <= 256:
        return n                      # full extent (lane constraint satisfied by "full dim")
    if n % 256 == 0:
        return 256                    # feed the 2x256 MXU on v6e/v7x
    return 128


_VMEM_LIMIT = 32 * 1024 * 1024        # well under v7x's 64 MiB physical VMEM


# ---------------------------------------------------------------------------
# Fused matmul + BN(scale,bias) + optional ReLU  (1x1 convs, im2col'd convs)
# ---------------------------------------------------------------------------
def _mm_bn_kernel(x_ref, w_ref, s_ref, b_ref, o_ref, *, relu):
    acc = jnp.dot(x_ref[...], w_ref[...], preferred_element_type=jnp.float32)
    r = acc * s_ref[...] + b_ref[...]
    if relu:
        r = jnp.maximum(r, 0.0)
    o_ref[...] = r.astype(o_ref.dtype)


def matmul_scale_bias(x, w, scale, bias, *, relu, out_dtype=jnp.bfloat16):
    """(x @ w) * scale + bias (+ReLU).  x:[M,K] bf16, w:[K,N] bf16, scale/bias:[N] f32.

    Single full-extent K block (no K grid axis, no zero padding), 256-wide M/N tiles
    when large, ragged edges handled by Pallas.
    """
    M, K = x.shape
    K2, N = w.shape
    assert K == K2
    tm, tn = _tile_m(M), _tile_n(N)
    grid = (pl.cdiv(M, tm), pl.cdiv(N, tn))
    s2 = scale.reshape(1, N).astype(jnp.float32)
    b2 = bias.reshape(1, N).astype(jnp.float32)
    return pl.pallas_call(
        functools.partial(_mm_bn_kernel, relu=relu),
        out_shape=jax.ShapeDtypeStruct((M, N), out_dtype),
        grid_spec=pltpu.PrefetchScalarGridSpec(
            num_scalar_prefetch=0,
            grid=grid,
            in_specs=[
                pl.BlockSpec((tm, K), lambda i, j: (i, 0)),
                pl.BlockSpec((K, tn), lambda i, j: (0, j)),
                pl.BlockSpec((1, tn), lambda i, j: (0, j)),
                pl.BlockSpec((1, tn), lambda i, j: (0, j)),
            ],
            out_specs=pl.BlockSpec((tm, tn), lambda i, j: (i, j)),
        ),
        compiler_params=pltpu.CompilerParams(
            dimension_semantics=("parallel", "parallel"),
            vmem_limit_bytes=_VMEM_LIMIT),
    )(x, w, s2, b2)


# ---------------------------------------------------------------------------
# Direct 3x3 stride-1 conv + BN + optional ReLU, no im2col.
#
# The padded activation is flattened to [N*Hp*Wp, C]; for tap (dy,dx) the operand of
# output row m is simply row m + dy*Wp + dx of that flat array (guard rows absorb the
# boundary).  Per M tile we DMA one overlapping row window (double buffered) from HBM
# and do 9 small dots against the resident [9, C, Cout] weight block.
# ---------------------------------------------------------------------------
def _conv3x3s1_kernel(xg_hbm, w_ref, s_ref, b_ref, o_ref, win, sem,
                      *, taps, tm, relu):
    i = pl.program_id(1)                      # M-block index (fastest axis)
    slot = i & 1
    win_rows = win.shape[1]

    # First M block of this cout tile: blocking fetch of window 0 into slot 0.
    @pl.when(i == 0)
    def _():
        pltpu.make_async_copy(xg_hbm.at[pl.ds(0, win_rows)],
                              win.at[0], sem.at[0]).start()

    # Wait for the window of the current step (started here if i==0, else prefetched).
    pltpu.make_async_copy(xg_hbm.at[pl.ds(0, win_rows)],
                          win.at[slot], sem.at[slot]).wait()

    # Prefetch next M block's window into the other slot.
    @pl.when(i + 1 < pl.num_programs(1))
    def _():
        start = (i + 1) * tm
        pltpu.make_async_copy(xg_hbm.at[pl.ds(start, win_rows)],
                              win.at[1 - slot], sem.at[1 - slot]).start()

    def compute(cur):
        acc = jnp.zeros((tm, o_ref.shape[-1]), jnp.float32)
        for t, u in enumerate(taps):          # 9 taps, static offsets
            acc = acc + jnp.dot(cur[pl.ds(u, tm), :], w_ref[t],
                                preferred_element_type=jnp.float32)
        r = acc * s_ref[...] + b_ref[...]
        if relu:
            r = jnp.maximum(r, 0.0)
        o_ref[...] = r.astype(o_ref.dtype)

    # Static slot unroll (keeps all compute-side ref indexing static).
    @pl.when(slot == 0)
    def _():
        compute(win.at[0])

    @pl.when(slot == 1)
    def _():
        compute(win.at[1])


def conv3x3_s1_bn(x, p, relu):
    N, H, W, C = x.shape
    Hp, Wp = H + 2, W + 2
    Mtot = N * Hp * Wp
    G = Wp + 1                                 # largest tap offset / guard rows
    tm = 256 if Mtot > 256 else Mtot
    mb = pl.cdiv(Mtot, tm)
    gb = mb * tm - Mtot + G                    # back guard so every window DMA is in-bounds
    cout = p["w9"].shape[2]
    tn = _tile_n(cout)
    nb = pl.cdiv(cout, tn)
    win_rows = tm + 2 * G

    xp = jnp.pad(x, ((0, 0), (1, 1), (1, 1), (0, 0)))
    xg = jnp.pad(xp.reshape(Mtot, C), ((G, gb), (0, 0)))       # flat padded + guards
    taps = tuple(dy * Wp + dx for dy in range(3) for dx in range(3))

    out = pl.pallas_call(
        functools.partial(_conv3x3s1_kernel, taps=taps, tm=tm, relu=relu),
        out_shape=jax.ShapeDtypeStruct((Mtot, cout), jnp.bfloat16),
        grid_spec=pltpu.PrefetchScalarGridSpec(
            num_scalar_prefetch=0,
            grid=(nb, mb),                     # cout tiles outer, M tiles inner (fast)
            in_specs=[
                pl.BlockSpec(memory_space=pl.ANY),                     # flat activation (HBM)
                pl.BlockSpec((9, C, tn), lambda j, i: (0, 0, j)),      # weights
                pl.BlockSpec((1, tn), lambda j, i: (0, j)),            # BN scale
                pl.BlockSpec((1, tn), lambda j, i: (0, j)),            # BN bias
            ],
            out_specs=pl.BlockSpec((tm, tn), lambda j, i: (i, j)),
            scratch_shapes=[
                pltpu.VMEM((2, win_rows, C), jnp.bfloat16),            # double-buffered window
                pltpu.SemaphoreType.DMA((2,)),
            ],
        ),
        # sequential: the manual prefetch chain must not be split across TensorCores.
        compiler_params=pltpu.CompilerParams(
            dimension_semantics=("arbitrary", "arbitrary"),
            vmem_limit_bytes=_VMEM_LIMIT),
    )(xg, p["w9"], p["scale"].reshape(1, cout), p["bias"].reshape(1, cout))

    # Outputs were computed on the padded grid; keep the interior.
    return out.reshape(N, Hp, Wp, cout)[:, 1:H + 1, 1:W + 1, :]


# ---------------------------------------------------------------------------
# im2col fallback (only for the few stride-2 3x3 convs: stem conv1 and the first
# 3x3 of stages 2-4).
# TODO(synk): fold the stride-2 taps into the windowed kernel as well to remove the
#             remaining host-side patch gather.
# ---------------------------------------------------------------------------
def _im2col(x, k, stride, pad):
    N, H, W, C = x.shape
    Ho = (H + 2 * pad - k) // stride + 1
    Wo = (W + 2 * pad - k) // stride + 1
    if pad:
        x = jnp.pad(x, ((0, 0), (pad, pad), (pad, pad), (0, 0)))
    cols = []
    for dy in range(k):
        for dx in range(k):
            cols.append(x[:, dy:dy + stride * (Ho - 1) + 1:stride,
                           dx:dx + stride * (Wo - 1) + 1:stride, :])
    patches = jnp.concatenate(cols, axis=-1)
    return patches.reshape(N * Ho * Wo, k * k * C), (N, Ho, Wo)


def conv_im2col_bn(x, p, stride, relu):
    k = p["k"]
    pad = (k - 1) // 2
    cols, (N, Ho, Wo) = _im2col(x, k, stride, pad)
    cin = x.shape[-1]
    w2 = p["w9"].reshape(k * k * cin, -1)
    y = matmul_scale_bias(cols, w2, p["scale"], p["bias"], relu=relu)
    return y.reshape(N, Ho, Wo, -1)


def conv1x1_bn(x, p, relu):
    N, H, W, C = x.shape
    w2 = p["w9"].reshape(C, -1)
    y = matmul_scale_bias(x.reshape(N * H * W, C), w2, p["scale"], p["bias"], relu=relu)
    return y.reshape(N, H, W, -1)


def conv_bn(x, p, stride, relu):
    if p["k"] == 1:
        assert stride == 1
        return conv1x1_bn(x, p, relu)
    if stride == 1:
        return conv3x3_s1_bn(x, p, relu)
    return conv_im2col_bn(x, p, stride, relu)


# ---------------------------------------------------------------------------
# Gridded elementwise / pooling kernels
# ---------------------------------------------------------------------------
def _add_relu_kernel(a_ref, b_ref, o_ref):
    o_ref[...] = jnp.maximum(a_ref[...] + b_ref[...], 0.0).astype(o_ref.dtype)


def add_relu(a, b):
    N, H, W, C = a.shape
    rows = N * H * W
    tb = 512 if rows > 512 else rows
    out = pl.pallas_call(
        _add_relu_kernel,
        out_shape=jax.ShapeDtypeStruct((rows, C), a.dtype),
        grid=(pl.cdiv(rows, tb),),
        in_specs=[pl.BlockSpec((tb, C), lambda i: (i, 0))] * 2,
        out_specs=pl.BlockSpec((tb, C), lambda i: (i, 0)),
        compiler_params=pltpu.CompilerParams(dimension_semantics=("parallel",)),
    )(a.reshape(rows, C), b.reshape(rows, C))
    return out.reshape(N, H, W, C)


def _avgpool_kernel(x_ref, o_ref):
    x = x_ref[...].astype(jnp.float32)                 # (th, 2, Wo, 2, C)
    s = jnp.sum(x, axis=3, keepdims=True)
    s = jnp.sum(s, axis=1, keepdims=True)              # (th, 1, Wo, 1, C)
    o_ref[...] = (0.25 * s).astype(o_ref.dtype)


def avgpool2x2s2(x):
    """ResNet-D 'avg_down' 2x2/s2 pool via a free host reshape + gridded reduce."""
    N, H, W, C = x.shape
    # TODO(synk): odd H/W would need AvgPool2d(ceil_mode=True) edge handling.
    assert H % 2 == 0 and W % 2 == 0
    Ho, Wo = H // 2, W // 2
    rows = N * Ho
    xr = x.reshape(rows, 2, Wo, 2, C)                  # pure metadata, no copy
    th = 64 if rows > 64 else rows
    out = pl.pallas_call(
        _avgpool_kernel,
        out_shape=jax.ShapeDtypeStruct((rows, 1, Wo, 1, C), x.dtype),
        grid=(pl.cdiv(rows, th),),
        in_specs=[pl.BlockSpec((th, 2, Wo, 2, C), lambda i: (i, 0, 0, 0, 0))],
        out_specs=pl.BlockSpec((th, 1, Wo, 1, C), lambda i: (i, 0, 0, 0, 0)),
        compiler_params=pltpu.CompilerParams(dimension_semantics=("parallel",)),
    )(xr)
    return out.reshape(N, Ho, Wo, C)


def _maxk_kernel(*refs):
    o_ref = refs[-1]
    m = refs[0][...]
    for r in refs[1:-1]:
        m = jnp.maximum(m, r[...])
    o_ref[...] = m


def maxpool3x3s2(x):
    # TODO(synk): the 9 shifted/strided views are still materialized by XLA in HBM
    # (~9x output size); a fully fused version needs strided in-kernel loads.
    N, H, W, C = x.shape
    Ho, Wo = (H - 1) // 2 + 1, (W - 1) // 2 + 1
    xp = jnp.pad(x, ((0, 0), (1, 1), (1, 1), (0, 0)), constant_values=-jnp.inf)
    views = []
    for dy in range(3):
        for dx in range(3):
            v = xp[:, dy:dy + 2 * (Ho - 1) + 1:2, dx:dx + 2 * (Wo - 1) + 1:2, :]
            views.append(v.reshape(N * Ho * Wo, C))
    rows = N * Ho * Wo
    tb = 512 if rows > 512 else rows
    out = pl.pallas_call(
        _maxk_kernel,
        out_shape=jax.ShapeDtypeStruct((rows, C), x.dtype),
        grid=(pl.cdiv(rows, tb),),
        in_specs=[pl.BlockSpec((tb, C), lambda i: (i, 0))] * 9,
        out_specs=pl.BlockSpec((tb, C), lambda i: (i, 0)),
        compiler_params=pltpu.CompilerParams(dimension_semantics=("parallel",)),
    )(*views)
    return out.reshape(N, Ho, Wo, C)


def _gap_kernel(x_ref, o_ref, *, inv_hw):
    s = jnp.sum(x_ref[...].astype(jnp.float32), axis=1, keepdims=True)
    o_ref[...] = s * inv_hw


def global_avg_pool(x):
    """AdaptiveAvgPool2d(1): x:[N,H,W,C] bf16 -> [N,C] f32."""
    N, H, W, C = x.shape
    hw = H * W
    xr = x.reshape(N, hw, C)
    out = pl.pallas_call(
        functools.partial(_gap_kernel, inv_hw=1.0 / hw),
        out_shape=jax.ShapeDtypeStruct((N, 1, C), jnp.float32),
        grid=(N,),
        in_specs=[pl.BlockSpec((1, hw, C), lambda n: (n, 0, 0))],
        out_specs=pl.BlockSpec((1, 1, C), lambda n: (n, 0, 0)),
        compiler_params=pltpu.CompilerParams(dimension_semantics=("parallel",)),
    )(xr)
    return out.reshape(N, C)


def _fc_kernel(x_ref, w_ref, b_ref, o_ref):
    o_ref[...] = (jnp.dot(x_ref[...], w_ref[...],
                          preferred_element_type=jnp.float32) + b_ref[...])


def fc(x, w, b):
    # Tiny [batch, n_features] @ [n_features, 11]: single full-extent block, no padding.
    N, F = x.shape
    C = w.shape[1]
    return pl.pallas_call(
        _fc_kernel,
        out_shape=jax.ShapeDtypeStruct((N, C), jnp.float32),
        in_specs=[pl.BlockSpec(memory_space=pltpu.MemorySpace.VMEM)] * 3,
        out_specs=pl.BlockSpec(memory_space=pltpu.MemorySpace.VMEM),
    )(x, w, b.reshape(1, C))


# ---------------------------------------------------------------------------
# Deterministic parameter init (BN folded to scale/bias, inference mode).
# Conv weights are stored once in bf16 (taps-major layout usable by all conv paths).
# ---------------------------------------------------------------------------
def _conv_bn_params(key, cin, cout, k):
    kw, kg, kb = jax.random.split(key, 3)
    fan_in = k * k * cin
    w = jax.random.normal(kw, (k, k, cin, cout), jnp.float32) / math.sqrt(fan_in)
    gamma = 1.0 + 0.05 * jax.random.normal(kg, (cout,), jnp.float32)
    beta = 0.05 * jax.random.normal(kb, (cout,), jnp.float32)
    eps = 1e-5  # running_mean=0, running_var=1 (synthetic init)
    return {
        "k": k,
        "w9": w.reshape(k * k, cin, cout).astype(jnp.bfloat16),
        "scale": (gamma / jnp.sqrt(1.0 + eps)).astype(jnp.float32),
        "bias": beta.astype(jnp.float32),
    }


def init_params(key, *, in_chans=3, stem_width=4, base_width=8,
                layers=(1, 1, 1, 1), num_classes=11):
    keys = iter(jax.random.split(key, 256))
    params = {}
    stem_out = base_width
    params["stem"] = [
        _conv_bn_params(next(keys), in_chans, stem_width, 3),   # conv1, stride 2
        _conv_bn_params(next(keys), stem_width, stem_width, 3),
        _conv_bn_params(next(keys), stem_width, stem_out, 3),
    ]
    expansion = 4
    in_ch = stem_out
    stages = []
    for si, nblocks in enumerate(layers):
        width = base_width * (2 ** si)
        blocks = []
        for bi in range(nblocks):
            stride = 2 if (si > 0 and bi == 0) else 1
            blk = {
                "stride": stride,
                "c1": _conv_bn_params(next(keys), in_ch, width, 1),
                "c2": _conv_bn_params(next(keys), width, width, 3),
                "c3": _conv_bn_params(next(keys), width, width * expansion, 1),
            }
            if stride != 1 or in_ch != width * expansion:
                blk["down"] = _conv_bn_params(next(keys), in_ch, width * expansion, 1)
            blocks.append(blk)
            in_ch = width * expansion
        stages.append(blocks)
    params["stages"] = stages
    params["n_features"] = in_ch
    kf, kfb = jax.random.split(next(keys))
    params["fc_w"] = (jax.random.normal(kf, (in_ch, num_classes), jnp.float32)
                      / math.sqrt(in_ch))
    params["fc_b"] = 0.01 * jax.random.normal(kfb, (num_classes,), jnp.float32)
    return params


# ---------------------------------------------------------------------------
# Forward pass (mirrors CustomResNet200D.forward with attention=None)
# ---------------------------------------------------------------------------
def bottleneck(x, blk):
    stride = blk["stride"]
    out = conv_bn(x, blk["c1"], 1, relu=True)
    out = conv_bn(out, blk["c2"], stride, relu=True)
    out = conv_bn(out, blk["c3"], 1, relu=False)
    sc = x
    if "down" in blk:
        if stride == 2:
            sc = avgpool2x2s2(sc)          # ResNet-D avg_down shortcut
        sc = conv_bn(sc, blk["down"], 1, relu=False)
    return add_relu(out, sc)


def forward(params, x_nchw):
    x = jnp.transpose(x_nchw, (0, 2, 3, 1)).astype(jnp.bfloat16)  # NCHW -> NHWC, bf16
    # deep stem
    x = conv_bn(x, params["stem"][0], stride=2, relu=True)
    x = conv_bn(x, params["stem"][1], stride=1, relu=True)
    x = conv_bn(x, params["stem"][2], stride=1, relu=True)
    x = maxpool3x3s2(x)
    # residual stages
    for blocks in params["stages"]:
        for blk in blocks:
            x = bottleneck(x, blk)
    features_nchw = jnp.transpose(x, (0, 3, 1, 2)).astype(jnp.float32)   # back to NCHW
    pooled = global_avg_pool(x)                                          # [N, n_features]
    logits = fc(pooled, params["fc_w"], params["fc_b"])                  # [N, num_classes]
    # return_mask=False -> (features, pooled_features, output)
    return features_nchw, pooled, logits


if __name__ == "__main__":
    key = jax.random.PRNGKey(0)
    pkey, xkey = jax.random.split(key)
    params = init_params(pkey)
    x = jax.random.normal(xkey, (2, 3, 32, 32), jnp.float32)     # NCHW, like PyTorch
    feats, pooled, logits = forward(params, x)
    jax.block_until_ready((feats, pooled, logits))
    assert feats.shape == (2, params["n_features"], 1, 1)
    assert pooled.shape == (2, params["n_features"])
    assert logits.shape == (2, 11)
    print("KERNEL_OK")
</pallas_src>

<mosaic_0001>
module attributes {stable_mosaic.version = 11 : i64} {
  func.func @_mm_bn_kernel(%arg0: i32, %arg1: i32, %arg2: memref<256x27xbf16, #tpu.memory_space<vmem>>, %arg3: memref<27x4xbf16, #tpu.memory_space<vmem>>, %arg4: memref<1x4xf32, #tpu.memory_space<vmem>>, %arg5: memref<1x4xf32, #tpu.memory_space<vmem>>, %arg6: memref<256x4xbf16, #tpu.memory_space<vmem>>) attributes {dimension_semantics = [#tpu.dimension_semantics<parallel>, #tpu.dimension_semantics<parallel>], iteration_bounds = array<i64: 2, 1>, scalar_prefetch = 0 : i64, scratch_operands = 0 : i64, tpu.core_type = #tpu.core_type<tc>, window_params = [{transform_indices = @transform_0, window_bounds = array<i64: 256, 27>}, {transform_indices = @transform_1, window_bounds = array<i64: 27, 4>}, {transform_indices = @transform_2, window_bounds = array<i64: 1, 4>}, {transform_indices = @transform_3, window_bounds = array<i64: 1, 4>}, {transform_indices = @transform_4, window_bounds = array<i64: 256, 4>}]} {
    %c0 = arith.constant 0 : index
    %c0_0 = arith.constant 0 : index
    %0 = vector.load %arg2[%c0, %c0_0] : memref<256x27xbf16, #tpu.memory_space<vmem>>, vector<256x27xbf16>
    %c0_1 = arith.constant 0 : index
    %c0_2 = arith.constant 0 : index
    %1 = vector.load %arg3[%c0_1, %c0_2] : memref<27x4xbf16, #tpu.memory_space<vmem>>, vector<27x4xbf16>
    %cst = arith.constant dense<0.000000e+00> : vector<256x4xf32>
    %2 = tpu.matmul %0, %1, %cst {dimension_numbers = #tpu.dot_dimension_numbers<[1], [0], [0], [1], [0, 0, 1, 1], [], []>} : vector<256x27xbf16>, vector<27x4xbf16>, vector<256x4xf32> -> vector<256x4xf32>
    %c0_3 = arith.constant 0 : index
    %c0_4 = arith.constant 0 : index
    %3 = vector.load %arg4[%c0_3, %c0_4] : memref<1x4xf32, #tpu.memory_space<vmem>>, vector<1x4xf32>
    %4 = vector.broadcast %3 : vector<1x4xf32> to vector<256x4xf32>
    %5 = arith.mulf %2, %4 : vector<256x4xf32>
    %c0_5 = arith.constant 0 : index
    %c0_6 = arith.constant 0 : index
    %6 = vector.load %arg5[%c0_5, %c0_6] : memref<1x4xf32, #tpu.memory_space<vmem>>, vector<1x4xf32>
    %7 = vector.broadcast %6 : vector<1x4xf32> to vector<256x4xf32>
    %8 = arith.addf %5, %7 : vector<256x4xf32>
    %cst_7 = arith.constant 0.000000e+00 : f32
    %9 = vector.broadcast %cst_7 : f32 to vector<256x4xf32>
    %10 = arith.maximumf %8, %9 : vector<256x4xf32>
    %11 = arith.truncf %10 : vector<256x4xf32> to vector<256x4xbf16>
    %c0_8 = arith.constant 0 : index
    %c0_9 = arith.constant 0 : index
    %12 = vector.load %arg6[%c0_8, %c0_9] : memref<256x4xbf16, #tpu.memory_space<vmem>>, vector<256x4xbf16>
    tpu.vector_store %arg6[%c0_8, %c0_9], %11 {strides = array<i32>} : memref<256x4xbf16, #tpu.memory_space<vmem>>, vector<256x4xbf16>,
    return
  }
  func.func @transform_0(%arg0: i32, %arg1: i32) -> (i32, i32) {
    %c0_i32 = arith.constant 0 : i32
    %c0_i32_0 = arith.constant 0 : i32
    return %arg0, %c0_i32 : i32, i32
  }
  func.func @transform_1(%arg0: i32, %arg1: i32) -> (i32, i32) {
    %c0_i32 = arith.constant 0 : i32
    %c0_i32_0 = arith.constant 0 : i32
    return %c0_i32, %arg1 : i32, i32
  }
  func.func @transform_2(%arg0: i32, %arg1: i32) -> (i32, i32) {
    %c0_i32 = arith.constant 0 : i32
    %c0_i32_0 = arith.constant 0 : i32
    return %c0_i32, %arg1 : i32, i32
  }
  func.func @transform_3(%arg0: i32, %arg1: i32) -> (i32, i32) {
    %c0_i32 = arith.constant 0 : i32
    %c0_i32_0 = arith.constant 0 : i32
    return %c0_i32, %arg1 : i32, i32
  }
  func.func @transform_4(%arg0: i32, %arg1: i32) -> (i32, i32) {
    %c0_i32 = arith.constant 0 : i32
    return %arg0, %arg1 : i32, i32
  }
}

</mosaic_0001>

<bundles_post_ra>
// kernel: tpu_custom_call.1
= control target key start
LH: loop header
LB: loop body
LE: loop exit
PB: predicated region body
PF: predicated region fallthrough
CT: control target
= control target key end

     0   :  { %s1025_s15 = smov 0   ;;  %s1027_s16 = smov 0   ;;  %s1248_s0 = inlined_call_operand.vmem [shape: bf16[512,27], index: 0, kind: input, shape index: {}]   ;;  %s1249_s1 = inlined_call_operand.vmem [shape: bf16[27,4], index: 1, kind: input, shape index: {}]   ;;  %s1250_s2 = inlined_call_operand.vmem [shape: f32[1,4], index: 2, kind: input, shape index: {}]   ;;  %s1251_s3 = inlined_call_operand.vmem [shape: f32[1,4], index: 3, kind: input, shape index: {}]   ;;  %s1252_s4 = inlined_call_operand.vmem [shape: bf16[512,4], index: 4, kind: output, shape index: {}]  }
   0x1   :  { %s1029_s17 = smov 0  }
   0x2 LB: > { %s26_s18 = sadd.s32 1, %s993_s16  ;;  %p829_p0 = scmp.ge.s32.totalorder %s997_s17, 1  ;;  %s997_s17 = sphi %s1029_s17, %s14_s17   ;;  %s993_s16 = sphi %s1027_s16, %s1254_s16   ;;  %s989_s15 = sphi %s1025_s15, %s1253_s15  }
   0x3   : > { %p28_p1 = scmp.ge.s32.totalorder %s26_s18, 2  ;;  %p202_p2 = scmp.lt.s32.totalorder %s997_s17, 3 }
   0x5   : > { %s1256_s18 = smov (%p28_p1, %s26_s18), 0  ;;  %p203_p3 = pnand %p829_p0, %p202_p2 }
   0x6   : > { %s830_s23 = sshll.u32 (!%p203_p3), %s989_s15, 5 }
   0x7   : > { %206 = sbr.rel (%p203_p3) target bundleno = 224 (0xe0), region = 36  ;;  %p242_p4 = scmp.lt.s32.totalorder (!%p203_p3), %s830_s23, 63 }
   0xc   : > { %v904_v0 = vld [vmem:[%s1249_s1 + $0x8] sm:$0xf]  ;;  %v941_v1 = vld [vmem:[%s1249_s1 + $0x8] sm:$0x30]  ;;  %vm443_vm0 = vcmask 1044480   ;;  %vm444_vm1 = vcmask 1045504  }
   0xd   : > { %v905_v2 = vor.u32 %v941_v1, %v904_v0  ;;  %v999_v3 = vmov 65535   ;;  %s1258_s23 = smov (!%p242_p4, %s830_s23), 63  ;;  %v940_v7 = vld [vmem:[%s1249_s1] sm:$0xff]  ;;  %vm394_vm2 = vcmask 220160   ;;  %vm675_vm3 = vcmask 27648  }
   0xe   : > { %v445_v4 = vsel %vm443_vm0, 4294967295, %v999_v3  ;;  %s831_s26 = sshll.u32 %s1258_s23, 2  ;;  %v1097_v24 = vld [vmem:[%s1250_s2] ss:$0 sm:$0xff] }
   0xf   : > { %v446_v5 = vsel %vm444_vm1, %v445_v4, 0  ;;  %s1060_s29 = scalar_lea.vmem %s1248_s0, %s831_s26  ;;  %v1102_v25 = vld [vmem:[%s1251_s3] ss:$0 sm:$0xff]  ;;  %s1113_s10 = scalar_lea.vmem %s1252_s4, %s831_s26 }
  0x10   : > { %v448_v6 = vand.u32 %v905_v2, %v446_v5  ;;  %v924_v8 = vld [vmem:[%s1060_s29] sm:$0xff]  ;;  %v925_v12 = vld [vmem:[%s1060_s29 + $0x8] sm:$0xff]  ;;  %v926_v16 = vld [vmem:[%s1060_s29 + $0x10] sm:$0xff] }
  0x11   : > { %v928_v9 = vld [vmem:[%s1060_s29 + $0x20] sm:$0xff]  ;;  %v929_v13 = vld [vmem:[%s1060_s29 + $0x28] sm:$0xff]  ;;  %v930_v17 = vld [vmem:[%s1060_s29 + $0x30] sm:$0xff] }
  0x12   : > { %456 = vmatpush.bf16.msra.mxu0 %v448_v6  ;;  %942 = vmatpush.bf16.msra.mxu1 %v448_v6  ;;  %v932_v10 = vld [vmem:[%s1060_s29 + $0x40] sm:$0xff]  ;;  %v933_v14 = vld [vmem:[%s1060_s29 + $0x48] sm:$0xff]  ;;  %v934_v18 = vld [vmem:[%s1060_s29 + $0x50] sm:$0xff] }
  0x13   : > { %943 = vmatpush.bf16.msra.mxu2 %v448_v6  ;;  %944 = vmatpush.bf16.msra.mxu3 %v448_v6  ;;  %v936_v11 = vld [vmem:[%s1060_s29 + $0x60] sm:$0xff]  ;;  %v937_v15 = vld [vmem:[%s1060_s29 + $0x68] sm:$0xff]  ;;  %v938_v19 = vld [vmem:[%s1060_s29 + $0x70] sm:$0xff] }
  0x14   : > { %v927_v20 = vld [vmem:[%s1060_s29 + $0x18] sm:$0xff] }
  0x15   : > { %v931_v21 = vld [vmem:[%s1060_s29 + $0x38] sm:$0xff] }
  0x16   : > { %457 = vmatpush.bf16.msra.mxu0 %v940_v7  ;;  %945 = vmatpush.bf16.msra.mxu1 %v940_v7  ;;  %v935_v22 = vld [vmem:[%s1060_s29 + $0x58] sm:$0xff] }
  0x17   : > { %946 = vmatpush.bf16.msra.mxu2 %v940_v7  ;;  %947 = vmatpush.bf16.msra.mxu3 %v940_v7  ;;  %v939_v23 = vld [vmem:[%s1060_s29 + $0x78] sm:$0xff] }
  0x19   : > { %906 = vmatmul.msk.bf16.vlgmr.msra.gmra.mxu0 %vm394_vm2, %v924_v8  ;;  %910 = vmatmul.msk.bf16.vlgmr.msra.gmra.mxu1 %vm394_vm2, %v928_v9 }
  0x1a   : > { %914 = vmatmul.msk.bf16.vlgmr.msra.gmra.mxu2 %vm394_vm2, %v932_v10  ;;  %918 = vmatmul.msk.bf16.vlgmr.msra.gmra.mxu3 %vm394_vm2, %v936_v11 }
  0x29   : > { %907 = vmatmul.msk.bf16.gmra.mxu0 %vm394_vm2, %v925_v12  ;;  %911 = vmatmul.msk.bf16.gmra.mxu1 %vm394_vm2, %v929_v13 }
  0x2a   : > { %915 = vmatmul.msk.bf16.gmra.mxu2 %vm394_vm2, %v933_v14  ;;  %919 = vmatmul.msk.bf16.gmra.mxu3 %vm394_vm2, %v937_v15 }
  0x39   : > { %908 = vmatmul.msk.bf16.gmra.mxu0 %vm394_vm2, %v926_v16  ;;  %912 = vmatmul.msk.bf16.gmra.mxu1 %vm394_vm2, %v930_v17 }
  0x3a   : > { %916 = vmatmul.msk.bf16.gmra.mxu2 %vm394_vm2, %v934_v18  ;;  %920 = vmatmul.msk.bf16.gmra.mxu3 %vm394_vm2, %v938_v19 }
  0x49   : > { %909 = vmatmul.msk.bf16.gmra.mxu0 %vm394_vm2, %v927_v20  ;;  %913 = vmatmul.msk.bf16.gmra.mxu1 %vm394_vm2, %v931_v21 }
  0x4a   : > { %917 = vmatmul.msk.bf16.gmra.mxu2 %vm394_vm2, %v935_v22  ;;  %921 = vmatmul.msk.bf16.gmra.mxu3 %vm394_vm2, %v939_v23 }
  0x96   : > { %v459_v26 = vpop.f32.mrf.mxu0  ;;  %v479_v27 = vpop.f32.mrf.mxu1 }
  0x97   : > { %v543_v28 = vmul.f32 %v1097_v24, %v459_v26  ;;  %v551_v29 = vmul.f32 %v1097_v24, %v479_v27 }
  0x99   : > { %v579_v30 = vadd.f32 %v1102_v25, %v543_v28  ;;  %v587_v31 = vadd.f32 %v1102_v25, %v551_v29 }
  0x9b   : > { %v611_v32 = vmax.f32 %v579_v30, 0.0  ;;  %v619_v33 = vmax.f32 %v587_v31, 0.0 }
  0x9d   : > { %v643_v34 = vpack.c.bf16 %v611_v32, %v611_v32  ;;  %v651_v35 = vpack.c.bf16 %v619_v33, %v619_v33  ;;  %v499_v36 = vpop.f32.mrf.mxu2  ;;  %v519_v37 = vpop.f32.mrf.mxu3 }
  0x9e   : > { %v559_v38 = vmul.f32 %v1097_v24, %v499_v36  ;;  %v567_v39 = vmul.f32 %v1097_v24, %v519_v37  ;;  %v461_v40 = vpop.f32.mrf.mxu0  ;;  %v481_v41 = vpop.f32.mrf.mxu1 }
  0x9f   : > { %676 = vst.msk [vmem:[%s1113_s10] sm:$0xf] %vm675_vm3, %v643_v34  ;;  %v544_v42 = vmul.f32 %v1097_v24, %v461_v40  ;;  %v552_v43 = vmul.f32 %v1097_v24, %v481_v41 }
  0xa0   : > { %684 = vst.msk [vmem:[%s1113_s10 + $0x20] sm:$0xf] %vm675_vm3, %v651_v35  ;;  %v595_v44 = vadd.f32 %v1102_v25, %v559_v38  ;;  %v603_v45 = vadd.f32 %v1102_v25, %v567_v39 }
  0xa1   : > { %v580_v46 = vadd.f32 %v1102_v25, %v544_v42  ;;  %v588_v47 = vadd.f32 %v1102_v25, %v552_v43 }
  0xa2   : > { %v627_v48 = vmax.f32 %v595_v44, 0.0  ;;  %v635_v49 = vmax.f32 %v603_v45, 0.0 }
  0xa3   : > { %v612_v50 = vmax.f32 %v580_v46, 0.0  ;;  %v620_v51 = vmax.f32 %v588_v47, 0.0 }
  0xa4   : > { %v659_v52 = vpack.c.bf16 %v627_v48, %v627_v48  ;;  %v667_v53 = vpack.c.bf16 %v635_v49, %v635_v49 }
  0xa5   : > { %v644_v54 = vpack.c.bf16 %v612_v50, %v612_v50  ;;  %v652_v55 = vpack.c.bf16 %v620_v51, %v620_v51  ;;  %v501_v56 = vpop.f32.mrf.mxu2  ;;  %v521_v57 = vpop.f32.mrf.mxu3 }
  0xa6   : > { %692 = vst.msk [vmem:[%s1113_s10 + $0x40] sm:$0xf] %vm675_vm3, %v659_v52  ;;  %v560_v58 = vmul.f32 %v1097_v24, %v501_v56  ;;  %v568_v59 = vmul.f32 %v1097_v24, %v521_v57  ;;  %v464_v60 = vpop.f32.mrf.mxu0  ;;  %v484_v61 = vpop.f32.mrf.mxu1 }
  0xa7   : > { %700 = vst.msk [vmem:[%s1113_s10 + $0x60] sm:$0xf] %vm675_vm3, %v667_v53  ;;  %v545_v62 = vmul.f32 %v1097_v24, %v464_v60  ;;  %v553_v63 = vmul.f32 %v1097_v24, %v484_v61 }
  0xa8   : > { %677 = vst.msk [vmem:[%s1113_s10 + $0x4] sm:$0xf] %vm675_vm3, %v644_v54  ;;  %v596_v0 = vadd.f32 %v1102_v25, %v560_v58  ;;  %v604_v1 = vadd.f32 %v1102_v25, %v568_v59 }
  0xa9   : > { %685 = vst.msk [vmem:[%s1113_s10 + $0x24] sm:$0xf] %vm675_vm3, %v652_v55  ;;  %v581_v2 = vadd.f32 %v1102_v25, %v545_v62  ;;  %v589_v3 = vadd.f32 %v1102_v25, %v553_v63 }
  0xaa   : > { %v628_v4 = vmax.f32 %v596_v0, 0.0  ;;  %v636_v5 = vmax.f32 %v604_v1, 0.0 }
  0xab   : > { %v613_v6 = vmax.f32 %v581_v2, 0.0  ;;  %v621_v7 = vmax.f32 %v589_v3, 0.0 }
  0xac   : > { %v660_v8 = vpack.c.bf16 %v628_v4, %v628_v4  ;;  %v668_v9 = vpack.c.bf16 %v636_v5, %v636_v5 }
  0xad   : > { %v645_v10 = vpack.c.bf16 %v613_v6, %v613_v6  ;;  %v653_v11 = vpack.c.bf16 %v621_v7, %v621_v7  ;;  %v504_v12 = vpop.f32.mrf.mxu2  ;;  %v524_v13 = vpop.f32.mrf.mxu3 }
  0xae   : > { %693 = vst.msk [vmem:[%s1113_s10 + $0x44] sm:$0xf] %vm675_vm3, %v660_v8  ;;  %v561_v14 = vmul.f32 %v1097_v24, %v504_v12  ;;  %v569_v15 = vmul.f32 %v1097_v24, %v524_v13  ;;  %v466_v16 = vpop.f32.mrf.mxu0  ;;  %v486_v17 = vpop.f32.mrf.mxu1 }
  0xaf   : > { %701 = vst.msk [vmem:[%s1113_s10 + $0x64] sm:$0xf] %vm675_vm3, %v668_v9  ;;  %v546_v18 = vmul.f32 %v1097_v24, %v466_v16  ;;  %v554_v19 = vmul.f32 %v1097_v24, %v486_v17 }
  0xb0   : > { %678 = vst.msk [vmem:[%s1113_s10 + $0x8] sm:$0xf] %vm675_vm3, %v645_v10  ;;  %v597_v20 = vadd.f32 %v1102_v25, %v561_v14  ;;  %v605_v21 = vadd.f32 %v1102_v25, %v569_v15 }
  0xb1   : > { %686 = vst.msk [vmem:[%s1113_s10 + $0x28] sm:$0xf] %vm675_vm3, %v653_v11  ;;  %v582_v22 = vadd.f32 %v1102_v25, %v546_v18  ;;  %v590_v23 = vadd.f32 %v1102_v25, %v554_v19 }
  0xb2   : > { %v629_v26 = vmax.f32 %v597_v20, 0.0  ;;  %v637_v27 = vmax.f32 %v605_v21, 0.0 }
  0xb3   : > { %v614_v28 = vmax.f32 %v582_v22, 0.0  ;;  %v622_v29 = vmax.f32 %v590_v23, 0.0 }
  0xb4   : > { %v661_v30 = vpack.c.bf16 %v629_v26, %v629_v26  ;;  %v669_v31 = vpack.c.bf16 %v637_v27, %v637_v27 }
  0xb5   : > { %v646_v32 = vpack.c.bf16 %v614_v28, %v614_v28  ;;  %v654_v33 = vpack.c.bf16 %v622_v29, %v622_v29  ;;  %v506_v34 = vpop.f32.mrf.mxu2  ;;  %v526_v35 = vpop.f32.mrf.mxu3 }
  0xb6   : > { %694 = vst.msk [vmem:[%s1113_s10 + $0x48] sm:$0xf] %vm675_vm3, %v661_v30  ;;  %v562_v36 = vmul.f32 %v1097_v24, %v506_v34  ;;  %v570_v37 = vmul.f32 %v1097_v24, %v526_v35  ;;  %v469_v38 = vpop.f32.mrf.mxu0  ;;  %v489_v39 = vpop.f32.mrf.mxu1 }
  0xb7   : > { %702 = vst.msk [vmem:[%s1113_s10 + $0x68] sm:$0xf] %vm675_vm3, %v669_v31  ;;  %v547_v40 = vmul.f32 %v1097_v24, %v469_v38  ;;  %v555_v41 = vmul.f32 %v1097_v24, %v489_v39 }
  0xb8   : > { %679 = vst.msk [vmem:[%s1113_s10 + $0xc] sm:$0xf] %vm675_vm3, %v646_v32  ;;  %v598_v42 = vadd.f32 %v1102_v25, %v562_v36  ;;  %v606_v43 = vadd.f32 %v1102_v25, %v570_v37 }
  0xb9   : > { %687 = vst.msk [vmem:[%s1113_s10 + $0x2c] sm:$0xf] %vm675_vm3, %v654_v33  ;;  %v583_v44 = vadd.f32 %v1102_v25, %v547_v40  ;;  %v591_v45 = vadd.f32 %v1102_v25, %v555_v41 }
  0xba   : > { %v630_v46 = vmax.f32 %v598_v42, 0.0  ;;  %v638_v47 = vmax.f32 %v606_v43, 0.0 }
  0xbb   : > { %v615_v48 = vmax.f32 %v583_v44, 0.0  ;;  %v623_v49 = vmax.f32 %v591_v45, 0.0 }
  0xbc   : > { %v662_v50 = vpack.c.bf16 %v630_v46, %v630_v46  ;;  %v670_v51 = vpack.c.bf16 %v638_v47, %v638_v47 }
  0xbd   : > { %v647_v52 = vpack.c.bf16 %v615_v48, %v615_v48  ;;  %v655_v53 = vpack.c.bf16 %v623_v49, %v623_v49  ;;  %v509_v54 = vpop.f32.mrf.mxu2  ;;  %v529_v55 = vpop.f32.mrf.mxu3 }
  0xbe   : > { %695 = vst.msk [vmem:[%s1113_s10 + $0x4c] sm:$0xf] %vm675_vm3, %v662_v50  ;;  %v563_v56 = vmul.f32 %v1097_v24, %v509_v54  ;;  %v571_v57 = vmul.f32 %v1097_v24, %v529_v55  ;;  %v471_v58 = vpop.f32.mrf.mxu0  ;;  %v491_v59 = vpop.f32.mrf.mxu1 }
  0xbf   : > { %703 = vst.msk [vmem:[%s1113_s10 + $0x6c] sm:$0xf] %vm675_vm3, %v670_v51  ;;  %v548_v60 = vmul.f32 %v1097_v24, %v471_v58  ;;  %v556_v61 = vmul.f32 %v1097_v24, %v491_v59 }
  0xc0   : > { %680 = vst.msk [vmem:[%s1113_s10 + $0x10] sm:$0xf] %vm675_vm3, %v647_v52  ;;  %v599_v62 = vadd.f32 %v1102_v25, %v563_v56  ;;  %v607_v63 = vadd.f32 %v1102_v25, %v571_v57 }
  0xc1   : > { %688 = vst.msk [vmem:[%s1113_s10 + $0x30] sm:$0xf] %vm675_vm3, %v655_v53  ;;  %v584_v0 = vadd.f32 %v1102_v25, %v548_v60  ;;  %v592_v1 = vadd.f32 %v1102_v25, %v556_v61 }
  0xc2   : > { %v631_v2 = vmax.f32 %v599_v62, 0.0  ;;  %v639_v3 = vmax.f32 %v607_v63, 0.0 }
  0xc3   : > { %v616_v4 = vmax.f32 %v584_v0, 0.0  ;;  %v624_v5 = vmax.f32 %v592_v1, 0.0 }
  0xc4   : > { %v663_v6 = vpack.c.bf16 %v631_v2, %v631_v2  ;;  %v671_v7 = vpack.c.bf16 %v639_v3, %v639_v3 }
  0xc5   : > { %v648_v8 = vpack.c.bf16 %v616_v4, %v616_v4  ;;  %v656_v9 = vpack.c.bf16 %v624_v5, %v624_v5  ;;  %v511_v10 = vpop.f32.mrf.mxu2  ;;  %v531_v11 = vpop.f32.mrf.mxu3 }
  0xc6   : > { %696 = vst.msk [vmem:[%s1113_s10 + $0x50] sm:$0xf] %vm675_vm3, %v663_v6  ;;  %v564_v12 = vmul.f32 %v1097_v24, %v511_v10  ;;  %v572_v13 = vmul.f32 %v1097_v24, %v531_v11  ;;  %v474_v14 = vpop.f32.mrf.mxu0  ;;  %v494_v15 = vpop.f32.mrf.mxu1 }
  0xc7   : > { %704 = vst.msk [vmem:[%s1113_s10 + $0x70] sm:$0xf] %vm675_vm3, %v671_v7  ;;  %v549_v16 = vmul.f32 %v1097_v24, %v474_v14  ;;  %v557_v17 = vmul.f32 %v1097_v24, %v494_v15 }
  0xc8   : > { %681 = vst.msk [vmem:[%s1113_s10 + $0x14] sm:$0xf] %vm675_vm3, %v648_v8  ;;  %v600_v18 = vadd.f32 %v1102_v25, %v564_v12  ;;  %v608_v19 = vadd.f32 %v1102_v25, %v572_v13 }
  0xc9   : > { %689 = vst.msk [vmem:[%s1113_s10 + $0x34] sm:$0xf] %vm675_vm3, %v656_v9  ;;  %v585_v20 = vadd.f32 %v1102_v25, %v549_v16  ;;  %v593_v21 = vadd.f32 %v1102_v25, %v557_v17 }
  0xca   : > { %v632_v22 = vmax.f32 %v600_v18, 0.0  ;;  %v640_v23 = vmax.f32 %v608_v19, 0.0 }
  0xcb   : > { %v617_v26 = vmax.f32 %v585_v20, 0.0  ;;  %v625_v27 = vmax.f32 %v593_v21, 0.0 }
  0xcc   : > { %v664_v28 = vpack.c.bf16 %v632_v22, %v632_v22  ;;  %v672_v29 = vpack.c.bf16 %v640_v23, %v640_v23 }
  0xcd   : > { %v649_v30 = vpack.c.bf16 %v617_v26, %v617_v26  ;;  %v657_v31 = vpack.c.bf16 %v625_v27, %v625_v27  ;;  %v514_v32 = vpop.f32.mrf.mxu2  ;;  %v534_v33 = vpop.f32.mrf.mxu3 }
  0xce   : > { %697 = vst.msk [vmem:[%s1113_s10 + $0x54] sm:$0xf] %vm675_vm3, %v664_v28  ;;  %v565_v34 = vmul.f32 %v1097_v24, %v514_v32  ;;  %v573_v35 = vmul.f32 %v1097_v24, %v534_v33  ;;  %v476_v36 = vpop.f32.mrf.mxu0  ;;  %v496_v37 = vpop.f32.mrf.mxu1 }
  0xcf   : > { %705 = vst.msk [vmem:[%s1113_s10 + $0x74] sm:$0xf] %vm675_vm3, %v672_v29  ;;  %v550_v38 = vmul.f32 %v1097_v24, %v476_v36  ;;  %v558_v39 = vmul.f32 %v1097_v24, %v496_v37 }
  0xd0   : > { %682 = vst.msk [vmem:[%s1113_s10 + $0x18] sm:$0xf] %vm675_vm3, %v649_v30  ;;  %v601_v40 = vadd.f32 %v1102_v25, %v565_v34  ;;  %v609_v41 = vadd.f32 %v1102_v25, %v573_v35 }
  0xd1   : > { %690 = vst.msk [vmem:[%s1113_s10 + $0x38] sm:$0xf] %vm675_vm3, %v657_v31  ;;  %v586_v42 = vadd.f32 %v1102_v25, %v550_v38  ;;  %v594_v43 = vadd.f32 %v1102_v25, %v558_v39 }
  0xd2   : > { %v633_v44 = vmax.f32 %v601_v40, 0.0  ;;  %v641_v45 = vmax.f32 %v609_v41, 0.0 }
  0xd3   : > { %v618_v46 = vmax.f32 %v586_v42, 0.0  ;;  %v626_v47 = vmax.f32 %v594_v43, 0.0 }
  0xd4   : > { %v665_v48 = vpack.c.bf16 %v633_v44, %v633_v44  ;;  %v673_v49 = vpack.c.bf16 %v641_v45, %v641_v45 }
  0xd5   : > { %v650_v50 = vpack.c.bf16 %v618_v46, %v618_v46  ;;  %v658_v51 = vpack.c.bf16 %v626_v47, %v626_v47  ;;  %v516_v52 = vpop.f32.mrf.mxu2  ;;  %v536_v53 = vpop.f32.mrf.mxu3 }
  0xd6   : > { %698 = vst.msk [vmem:[%s1113_s10 + $0x58] sm:$0xf] %vm675_vm3, %v665_v48  ;;  %v566_v54 = vmul.f32 %v1097_v24, %v516_v52  ;;  %v574_v55 = vmul.f32 %v1097_v24, %v536_v53 }
  0xd7   : > { %706 = vst.msk [vmem:[%s1113_s10 + $0x78] sm:$0xf] %vm675_vm3, %v673_v49 }
  0xd8   : > { %683 = vst.msk [vmem:[%s1113_s10 + $0x1c] sm:$0xf] %vm675_vm3, %v650_v50  ;;  %v602_v56 = vadd.f32 %v1102_v25, %v566_v54  ;;  %v610_v57 = vadd.f32 %v1102_v25, %v574_v55 }
  0xd9   : > { %691 = vst.msk [vmem:[%s1113_s10 + $0x3c] sm:$0xf] %vm675_vm3, %v658_v51 }
  0xda   : > { %v634_v58 = vmax.f32 %v602_v56, 0.0  ;;  %v642_v59 = vmax.f32 %v610_v57, 0.0 }
  0xdc   : > { %v666_v60 = vpack.c.bf16 %v634_v58, %v634_v58  ;;  %v674_v61 = vpack.c.bf16 %v642_v59, %v642_v59 }
  0xde   : > { %699 = vst.msk [vmem:[%s1113_s10 + $0x5c] sm:$0xf] %vm675_vm3, %v666_v60 }
  0xdf   : > { %707 = vst.msk [vmem:[%s1113_s10 + $0x7c] sm:$0xf] %vm675_vm3, %v674_v61 }
  0xe0 PF: > { %s14_s17 = sadd.s32 1, %s997_s17   ;;  %s1253_s15 = smov %s993_s16 }
  0xe1   : > { %p11_p5 = scmp.ge.s32.totalorder %s14_s17, 4   ;;  %s1254_s16 = smov %s1256_s18 }
  0xe3   :  { %13 = sbr.rel (!%p11_p5) target bundleno = 2 (0x2), region = 75 }

</bundles_post_ra>
